<compile_context>
chip_gen: v7x
topology: tpu7x:2x2x1
jax: 0.10.0
libtpu: 0.0.40
codegen_flags: <defaults>
</compile_context>

<pallas_src>
import jax
import jax.numpy as jnp
from jax.experimental import pallas as pl
from jax.experimental.pallas import tpu as pltpu

_HIDDEN = 128          # fc1 output width, fixed by the module definition
_TM_CAP = 8192         # max batch rows per tile


def _round_up(v, m):
    return ((v + m - 1) // m) * m


def _round_down(v, m):
    return (v // m) * m


def _vmem_budget_and_limit():
    """Per-chip (budget for tile sizing, scoped vmem_limit_bytes)."""
    try:
        vmem = int(getattr(pltpu.get_tpu_info(), "vmem_capacity_bytes", 64 << 20))
    except Exception:
        vmem = 64 << 20  # unknown chip: assume the smaller (v7x-class) VMEM
    if vmem >= (96 << 20):          # v5e / v6e: 128 MiB physical VMEM
        return 48 << 20, 96 << 20
    return 20 << 20, 32 << 20       # v7x-class: 64 MiB per TensorCore


def _choose_tm(k_cols, latent, x_isz, w_isz, o_isz, pack, budget,
               with_acc_scratch=False, tm_cap=_TM_CAP):
    """Largest batch tile fitting the VMEM budget (double-buffered tiles)."""
    # Grid-invariant weight/bias blocks (Pallas still allocates 2 buffers each).
    fixed = 2 * (k_cols * _HIDDEN + _HIDDEN * latent) * w_isz
    fixed += 2 * 2 * (_HIDDEN + latent) * 4
    per_row = (2 * k_cols * x_isz            # x tile (double-buffered)
               + 2 * latent * o_isz          # out tile (double-buffered)
               + (_HIDDEN + latent) * 4)     # in-kernel f32 temporaries
    if with_acc_scratch:
        per_row += _HIDDEN * 4               # f32 accumulator scratch
    avail = budget - fixed
    if avail <= 0:
        return pack
    tm = min(avail // per_row, tm_cap)
    if tm >= 128:
        tm = _round_down(tm, 128)
    else:
        tm = max(pack, _round_down(tm, pack))
    return int(tm)


def _pick_k_tile(input_dim, max_k):
    """Largest 128-multiple <= max_k that divides input_dim (pad K otherwise)."""
    cap = max(128, _round_down(min(max_k, input_dim), 128))
    for tk in range(cap, 0, -128):
        if input_dim % tk == 0:
            return tk, 0
    tk = cap
    return tk, _round_up(input_dim, tk) - input_dim


# ---------------------------------------------------------------------------
# Kernels
# ---------------------------------------------------------------------------
def _encoder_kernel(x_ref, w1t_ref, b1_ref, w2t_ref, b2_ref, o_ref):
    # x_ref: (TM, input_dim)  w1t_ref: (input_dim, 128)  b1_ref: (1, 128)
    # w2t_ref: (128, latent)  b2_ref: (1, latent)        o_ref: (TM, latent)
    h = jnp.dot(x_ref[...], w1t_ref[...], preferred_element_type=jnp.float32)
    h = jnp.maximum(h + b1_ref[...], 0.0)
    y = jnp.dot(h.astype(w2t_ref.dtype), w2t_ref[...],
                preferred_element_type=jnp.float32)
    o_ref[...] = (y + b2_ref[...]).astype(o_ref.dtype)


def _encoder_kernel_ktiled(x_ref, w1t_ref, b1_ref, w2t_ref, b2_ref, o_ref,
                           acc_ref):
    # Grid: (m, k); fc1 contraction tiled over input_dim with an f32 accumulator.
    k = pl.program_id(1)

    @pl.when(k == 0)
    def _():
        acc_ref[...] = jnp.zeros_like(acc_ref)

    acc_ref[...] += jnp.dot(x_ref[...], w1t_ref[...],
                            preferred_element_type=jnp.float32)

    @pl.when(k == pl.num_programs(1) - 1)
    def _():
        h = jnp.maximum(acc_ref[...] + b1_ref[...], 0.0)
        y = jnp.dot(h.astype(w2t_ref.dtype), w2t_ref[...],
                    preferred_element_type=jnp.float32)
        o_ref[...] = (y + b2_ref[...]).astype(o_ref.dtype)


# ---------------------------------------------------------------------------
# Wrapper
# ---------------------------------------------------------------------------
def encoder_forward(x, w1, b1, w2, b2, *, tm=None, compute_dtype=None,
                    out_dtype=None, k_tile_threshold=4096):
    """x: (B, input_dim). w1: (128, input_dim), b1: (128,),
       w2: (latent_dim, 128), b2: (latent_dim,). Returns (B, latent_dim)."""
    B, input_dim = x.shape
    hidden = w1.shape[0]
    latent_dim = w2.shape[0]
    assert hidden == _HIDDEN, "fc1 hidden width must be 128 (module definition)"
    if out_dtype is None:
        out_dtype = x.dtype

    # One-time weight transposes in the wrapper (PyTorch W[out,in] -> [in,out]);
    # no XLU transpose inside the kernel per grid step.
    w1t = jnp.transpose(w1)                       # (input_dim, 128)
    w2t = jnp.transpose(w2)                       # (128, latent_dim)
    b1_2d = b1.reshape(1, hidden).astype(jnp.float32)
    b2_2d = b2.reshape(1, latent_dim).astype(jnp.float32)

    # Optional low-precision MXU inputs; accumulation stays f32 in-kernel.
    if compute_dtype is not None:
        x = x.astype(compute_dtype)
        w1t = w1t.astype(compute_dtype)
        w2t = w2t.astype(compute_dtype)

    x_isz = jnp.dtype(x.dtype).itemsize
    w_isz = jnp.dtype(w1t.dtype).itemsize
    o_isz = jnp.dtype(out_dtype).itemsize
    pack = max(8, 32 // x_isz)                    # sublane pack: 8/16/32

    budget, vmem_limit = _vmem_budget_and_limit()
    use_ktiling = input_dim > k_tile_threshold

    if not use_ktiling:
        # ---------------- standard path: weights fully resident ----------------
        if tm is None:
            tm = _choose_tm(input_dim, latent_dim, x_isz, w_isz, o_isz,
                            pack, budget)
        tm = int(min(tm, B))                      # full-dim block when B <= tm
        n_steps = pl.cdiv(B, tm)                  # partial last block handled by Pallas

        return pl.pallas_call(
            _encoder_kernel,
            out_shape=jax.ShapeDtypeStruct((B, latent_dim), out_dtype),
            grid_spec=pltpu.PrefetchScalarGridSpec(
                num_scalar_prefetch=0,
                grid=(n_steps,),
                in_specs=[
                    pl.BlockSpec((tm, input_dim), lambda i: (i, 0)),       # x tile
                    pl.BlockSpec((input_dim, hidden), lambda i: (0, 0)),   # W1.T
                    pl.BlockSpec((1, hidden), lambda i: (0, 0)),           # b1
                    pl.BlockSpec((hidden, latent_dim), lambda i: (0, 0)),  # W2.T
                    pl.BlockSpec((1, latent_dim), lambda i: (0, 0)),       # b2
                ],
                out_specs=pl.BlockSpec((tm, latent_dim), lambda i: (i, 0)),
            ),
            compiler_params=pltpu.CompilerParams(
                dimension_semantics=("parallel",),
                vmem_limit_bytes=vmem_limit,
            ),
        )(x, w1t, b1_2d, w2t, b2_2d)

    # ---------------- K-tiled fallback: large input_dim --------------------
    tk, k_pad = _pick_k_tile(input_dim, k_tile_threshold)
    if k_pad:
        # Rare path (input_dim with no nice divisor): zero-pad the contraction
        # dim so partial K blocks never accumulate garbage.
        x = jnp.pad(x, ((0, 0), (0, k_pad)))
        w1t = jnp.pad(w1t, ((0, k_pad), (0, 0)))
    k_cols = input_dim + k_pad
    n_k = k_cols // tk

    if tm is None:
        tm = _choose_tm(tk, latent_dim, x_isz, w_isz, o_isz, pack, budget,
                        with_acc_scratch=True)
    tm = int(min(tm, B))
    n_m = pl.cdiv(B, tm)

    return pl.pallas_call(
        _encoder_kernel_ktiled,
        out_shape=jax.ShapeDtypeStruct((B, latent_dim), out_dtype),
        grid_spec=pltpu.PrefetchScalarGridSpec(
            num_scalar_prefetch=0,
            grid=(n_m, n_k),
            in_specs=[
                pl.BlockSpec((tm, tk), lambda i, k: (i, k)),               # x tile
                pl.BlockSpec((tk, hidden), lambda i, k: (k, 0)),           # W1.T tile
                pl.BlockSpec((1, hidden), lambda i, k: (0, 0)),            # b1
                pl.BlockSpec((hidden, latent_dim), lambda i, k: (0, 0)),   # W2.T
                pl.BlockSpec((1, latent_dim), lambda i, k: (0, 0)),        # b2
            ],
            out_specs=pl.BlockSpec((tm, latent_dim), lambda i, k: (i, 0)),
            scratch_shapes=[pltpu.VMEM((tm, hidden), jnp.float32)],
        ),
        compiler_params=pltpu.CompilerParams(
            dimension_semantics=("parallel", "arbitrary"),
            vmem_limit_bytes=vmem_limit,
        ),
    )(x, w1t, b1_2d, w2t, b2_2d)


# ---------------------------------------------------------------------------
# Test harness
# ---------------------------------------------------------------------------
def init_params(key, input_dim, latent_dim):
    """Deterministic synthetic parameters matching nn.Linear shapes."""
    hidden = _HIDDEN
    k1, k2, k3, k4 = jax.random.split(key, 4)
    lim1 = 1.0 / jnp.sqrt(input_dim)
    lim2 = 1.0 / jnp.sqrt(hidden)
    w1 = jax.random.uniform(k1, (hidden, input_dim), jnp.float32, -lim1, lim1)
    b1 = jax.random.uniform(k2, (hidden,), jnp.float32, -lim1, lim1)
    w2 = jax.random.uniform(k3, (latent_dim, hidden), jnp.float32, -lim2, lim2)
    b2 = jax.random.uniform(k4, (latent_dim,), jnp.float32, -lim2, lim2)
    return w1, b1, w2, b2


def _reference(x, w1, b1, w2, b2):
    return jnp.maximum(x @ w1.T + b1, 0.0) @ w2.T + b2


if __name__ == "__main__":
    key = jax.random.PRNGKey(0)
    kx, kp, kx2, kp2, kx3 = jax.random.split(key, 5)

    # Small shapes consistent with the module: batch=8, input_dim=32, latent=16.
    B, input_dim, latent_dim = 8, 32, 16
    x = jax.random.normal(kx, (B, input_dim), jnp.float32)
    w1, b1, w2, b2 = init_params(kp, input_dim, latent_dim)

    out = jax.block_until_ready(encoder_forward(x, w1, b1, w2, b2))
    ref = _reference(x, w1, b1, w2, b2)
    assert out.shape == (B, latent_dim)
    assert jnp.allclose(out, ref, atol=1e-5, rtol=1e-5)

    # Ragged batch with several grid steps: exercises the in-kernel partial
    # last-block handling (no wrapper pad/slice copies).
    B2 = 300
    x2 = jax.random.normal(kx2, (B2, input_dim), jnp.float32)
    out2 = jax.block_until_ready(encoder_forward(x2, w1, b1, w2, b2, tm=128))
    ref2 = _reference(x2, w1, b1, w2, b2)
    assert out2.shape == (B2, latent_dim)
    assert jnp.allclose(out2, ref2, atol=1e-5, rtol=1e-5)

    # bf16 MXU-input path (f32 accumulation / f32 output) — looser tolerance.
    out3 = jax.block_until_ready(
        encoder_forward(x2, w1, b1, w2, b2, compute_dtype=jnp.bfloat16, tm=128))
    assert jnp.allclose(out3, ref2, atol=5e-2, rtol=5e-2)

    # K-tiled fallback path (forced with a tiny threshold to exercise it).
    B3, input_dim3 = 64, 256
    x3 = jax.random.normal(kx3, (B3, input_dim3), jnp.float32)
    w1b, b1b, w2b, b2b = init_params(kp2, input_dim3, latent_dim)
    out4 = jax.block_until_ready(
        encoder_forward(x3, w1b, b1b, w2b, b2b, tm=24, k_tile_threshold=128))
    ref4 = _reference(x3, w1b, b1b, w2b, b2b)
    assert out4.shape == (B3, latent_dim)
    assert jnp.allclose(out4, ref4, atol=1e-3, rtol=1e-3)

    print("KERNEL_OK")
</pallas_src>

<mosaic_0001>
module attributes {stable_mosaic.version = 11 : i64} {
  func.func @_encoder_kernel(%arg0: i32, %arg1: memref<8x32xf32, #tpu.memory_space<vmem>>, %arg2: memref<32x128xf32, #tpu.memory_space<vmem>>, %arg3: memref<1x128xf32, #tpu.memory_space<vmem>>, %arg4: memref<128x16xf32, #tpu.memory_space<vmem>>, %arg5: memref<1x16xf32, #tpu.memory_space<vmem>>, %arg6: memref<8x16xf32, #tpu.memory_space<vmem>>) attributes {dimension_semantics = [#tpu.dimension_semantics<parallel>], iteration_bounds = array<i64: 1>, scalar_prefetch = 0 : i64, scratch_operands = 0 : i64, tpu.core_type = #tpu.core_type<tc>, window_params = [{transform_indices = @transform_0, window_bounds = array<i64: 8, 32>}, {pipeline_mode = #tpu.pipeline_mode<synchronous>, transform_indices = @transform_1, window_bounds = array<i64: 32, 128>}, {pipeline_mode = #tpu.pipeline_mode<synchronous>, transform_indices = @transform_2, window_bounds = array<i64: 1, 128>}, {pipeline_mode = #tpu.pipeline_mode<synchronous>, transform_indices = @transform_3, window_bounds = array<i64: 128, 16>}, {pipeline_mode = #tpu.pipeline_mode<synchronous>, transform_indices = @transform_4, window_bounds = array<i64: 1, 16>}, {transform_indices = @transform_5, window_bounds = array<i64: 8, 16>}]} {
    %c0 = arith.constant 0 : index
    %c0_0 = arith.constant 0 : index
    %0 = vector.load %arg1[%c0, %c0_0] : memref<8x32xf32, #tpu.memory_space<vmem>>, vector<8x32xf32>
    %c0_1 = arith.constant 0 : index
    %c0_2 = arith.constant 0 : index
    %1 = vector.load %arg2[%c0_1, %c0_2] : memref<32x128xf32, #tpu.memory_space<vmem>>, vector<32x128xf32>
    %cst = arith.constant dense<0.000000e+00> : vector<8x128xf32>
    %2 = tpu.matmul %0, %1, %cst {dimension_numbers = #tpu.dot_dimension_numbers<[1], [0], [0], [1], [0, 0, 1, 1], [], []>} : vector<8x32xf32>, vector<32x128xf32>, vector<8x128xf32> -> vector<8x128xf32>
    %c0_3 = arith.constant 0 : index
    %c0_4 = arith.constant 0 : index
    %3 = vector.load %arg3[%c0_3, %c0_4] : memref<1x128xf32, #tpu.memory_space<vmem>>, vector<1x128xf32>
    %4 = vector.broadcast %3 : vector<1x128xf32> to vector<8x128xf32>
    %5 = arith.addf %2, %4 : vector<8x128xf32>
    %cst_5 = arith.constant 0.000000e+00 : f32
    %6 = vector.broadcast %cst_5 : f32 to vector<8x128xf32>
    %7 = arith.maximumf %5, %6 : vector<8x128xf32>
    %c0_6 = arith.constant 0 : index
    %c0_7 = arith.constant 0 : index
    %8 = vector.load %arg4[%c0_6, %c0_7] : memref<128x16xf32, #tpu.memory_space<vmem>>, vector<128x16xf32>
    %cst_8 = arith.constant dense<0.000000e+00> : vector<8x16xf32>
    %9 = tpu.matmul %7, %8, %cst_8 {dimension_numbers = #tpu.dot_dimension_numbers<[1], [0], [0], [1], [0, 0, 1, 1], [], []>} : vector<8x128xf32>, vector<128x16xf32>, vector<8x16xf32> -> vector<8x16xf32>
    %c0_9 = arith.constant 0 : index
    %c0_10 = arith.constant 0 : index
    %10 = vector.load %arg5[%c0_9, %c0_10] : memref<1x16xf32, #tpu.memory_space<vmem>>, vector<1x16xf32>
    %11 = vector.broadcast %10 : vector<1x16xf32> to vector<8x16xf32>
    %12 = arith.addf %9, %11 : vector<8x16xf32>
    %c0_11 = arith.constant 0 : index
    %c0_12 = arith.constant 0 : index
    %13 = vector.load %arg6[%c0_11, %c0_12] : memref<8x16xf32, #tpu.memory_space<vmem>>, vector<8x16xf32>
    tpu.vector_store %arg6[%c0_11, %c0_12], %12 {strides = array<i32>} : memref<8x16xf32, #tpu.memory_space<vmem>>, vector<8x16xf32>,
    return
  }
  func.func @transform_0(%arg0: i32) -> (i32, i32) {
    %c0_i32 = arith.constant 0 : i32
    %c0_i32_0 = arith.constant 0 : i32
    return %arg0, %c0_i32 : i32, i32
  }
  func.func @transform_1(%arg0: i32) -> (i32, i32) {
    %c0_i32 = arith.constant 0 : i32
    %c0_i32_0 = arith.constant 0 : i32
    %c0_i32_1 = arith.constant 0 : i32
    return %c0_i32, %c0_i32_0 : i32, i32
  }
  func.func @transform_2(%arg0: i32) -> (i32, i32) {
    %c0_i32 = arith.constant 0 : i32
    %c0_i32_0 = arith.constant 0 : i32
    %c0_i32_1 = arith.constant 0 : i32
    return %c0_i32, %c0_i32_0 : i32, i32
  }
  func.func @transform_3(%arg0: i32) -> (i32, i32) {
    %c0_i32 = arith.constant 0 : i32
    %c0_i32_0 = arith.constant 0 : i32
    %c0_i32_1 = arith.constant 0 : i32
    return %c0_i32, %c0_i32_0 : i32, i32
  }
  func.func @transform_4(%arg0: i32) -> (i32, i32) {
    %c0_i32 = arith.constant 0 : i32
    %c0_i32_0 = arith.constant 0 : i32
    %c0_i32_1 = arith.constant 0 : i32
    return %c0_i32, %c0_i32_0 : i32, i32
  }
  func.func @transform_5(%arg0: i32) -> (i32, i32) {
    %c0_i32 = arith.constant 0 : i32
    %c0_i32_0 = arith.constant 0 : i32
    return %arg0, %c0_i32 : i32, i32
  }
}

</mosaic_0001>

<bundles_post_ra>
// kernel: tpu_custom_call.1
= control target key start
LH: loop header
LB: loop body
LE: loop exit
PB: predicated region body
PF: predicated region fallthrough
CT: control target
= control target key end

     0   :  { %v346_v3 = vmov 0.0|0.0   ;;  %vm347_vm0 = vmmov 0   ;;  %v348_v6 = vmov 0.0   ;;  %s461_s0 = inlined_call_operand.vmem [shape: f32[8,32], index: 0, kind: input, shape index: {}]   ;;  %s462_s1 = inlined_call_operand.vmem [shape: f32[32,128], index: 1, kind: input, shape index: {}]   ;;  %s463_s2 = inlined_call_operand.vmem [shape: f32[1,128], index: 2, kind: input, shape index: {}]   ;;  %s464_s3 = inlined_call_operand.vmem [shape: f32[128,16], index: 3, kind: input, shape index: {}]   ;;  %s465_s4 = inlined_call_operand.vmem [shape: f32[1,16], index: 4, kind: input, shape index: {}]   ;;  %s466_s5 = inlined_call_operand.hbm [shape: f32[8,16], index: 5, kind: output, shape index: {}]  }
   0x1   :  { %v22_v0 = vld [vmem:[%s462_s1] sm:$0xff]  ;;  %v23_v1 = vld [vmem:[%s462_s1 + $0x8] sm:$0xff]  ;;  %v24_v2 = vld [vmem:[%s462_s1 + $0x10] sm:$0xff]  ;;  %288 = vmatprep.subr.bf16.mxu0 %v346_v3  ;;  %250 = vmatprep.mubr.msk.f32.mxu0 %vm347_vm0, %v348_v6 }
   0x2   :  { %v289_v4 = vpack.c.bf16 %v23_v1, %v22_v0  ;;  %v25_v5 = vld [vmem:[%s462_s1 + $0x18] sm:$0xff]  ;;  %v108_v7 = vld [vmem:[%s464_s3] sm:$0xff]  ;;  %294 = vmatprep.subr.bf16.mxu1 %v346_v3  ;;  %v109_v8 = vld [vmem:[%s464_s3 + $0x8] sm:$0xff]  ;;  %285 = vmatprep.mubr.msk.f32.mxu1 %vm347_vm0, %v348_v6 }
   0x3   :  { %v110_v9 = vld [vmem:[%s464_s3 + $0x10] sm:$0xff]  ;;  %v111_v10 = vld [vmem:[%s464_s3 + $0x18] sm:$0xff]  ;;  %v292_v11 = vpack.c.bf16 %v25_v5, %v24_v2  ;;  %v295_v12 = vpack.c.bf16 %v109_v8, %v108_v7  ;;  %v112_v14 = vld [vmem:[%s464_s3 + $0x20] sm:$0xff] }
   0x4   :  { %290 = vmatpush3.bf16.msra.mxu0 %v289_v4  ;;  %v298_v13 = vpack.c.bf16 %v111_v10, %v110_v9  ;;  %v113_v15 = vld [vmem:[%s464_s3 + $0x28] sm:$0xff] }
   0x5   :  { %291 = vmatprep.subr.bf16.mxu0 %v346_v3  ;;  %296 = vmatpush3.bf16.msra.mxu1 %v295_v12 }
   0x6   :  { %297 = vmatprep.subr.bf16.mxu1 %v346_v3 }
   0x7   :  { %10 = vsyncpa [#allocation3], 0  ;;  %v21_v16 = vld [vmem:[%s461_s0] sm:$0xff]  ;;  %vm33_vm1 = vcmask 261120   ;;  %v301_v17 = vpack.c.bf16 %v113_v15, %v112_v14  ;;  %v114_v18 = vld [vmem:[%s464_s3 + $0x30] sm:$0xff]  ;;  %s349_s11 = smov [#allocation2]  }
   0x8   :  { %293 = vmatpush3.bf16.msra.mxu0 %v292_v11  ;;  %v115_v19 = vld [vmem:[%s464_s3 + $0x38] sm:$0xff]  ;;  %v116_v21 = vld [vmem:[%s464_s3 + $0x40] sm:$0xff]  ;;  %v117_v22 = vld [vmem:[%s464_s3 + $0x48] sm:$0xff]  ;;  %s209_s12 = sshll.u32 %s349_s11, 4  ;;  %vm201_vm2 = vcmask 130048   ;;  %s210_s12 = int_to_ptr.vmem [resolvable:$true] %s209_s12 }
   0x9   :  { %299 = vmatpush3.bf16.msra.mxu1 %v298_v13  ;;  %v304_v20 = vpack.c.bf16 %v115_v19, %v114_v18  ;;  %v307_v23 = vpack.c.bf16 %v117_v22, %v116_v21  ;;  %v118_v24 = vld [vmem:[%s464_s3 + $0x50] sm:$0xff]  ;;  %v119_v25 = vld [vmem:[%s464_s3 + $0x58] sm:$0xff]  ;;  %v120_v27 = vld [vmem:[%s464_s3 + $0x60] sm:$0xff]  ;;  %p327_p1 = scmp.lt.s32.totalorder %s210_s12, %s210_s12 }
   0xa   :  { %300 = vmatprep.subr.bf16.mxu1 %v346_v3  ;;  %v310_v26 = vpack.c.bf16 %v119_v25, %v118_v24  ;;  %v121_v28 = vld [vmem:[%s464_s3 + $0x68] sm:$0xff]  ;;  %v122_v30 = vld [vmem:[%s464_s3 + $0x70] sm:$0xff]  ;;  %v123_v31 = vld [vmem:[%s464_s3 + $0x78] sm:$0xff]  ;;  %s322_s3 = scalar_lea.vmem %s210_s12, 128 }
   0xb   :  { %251 = vmatmul.mubr.msk.f32.vlgmr.msra.gmra.mrb[0].mxu0 %vm33_vm1, %v21_v16  ;;  %v313_v29 = vpack.c.bf16 %v121_v28, %v120_v27  ;;  %v316_v32 = vpack.c.bf16 %v123_v31, %v122_v30  ;;  %v217_v33 = vld [vmem:[%s463_s2] ss:$0 sm:$0xff]  ;;  %p323_p0 = scmp.ne.s32.totalorder %s210_s12, %s322_s3  ;;  %p328_p2 = scmp.lt.s32.totalorder %s322_s3, %s322_s3 }
   0xc   :  { %v219_v38 = vld [vmem:[%s465_s4] ss:$0 sm:$0xff] }
   0xd   :  { %302 = vmatpush3.bf16.msra.mxu1 %v301_v17  ;;  %p329_p3 = por %p328_p2, %p327_p1 }
   0xe   :  { %303 = vmatprep.subr.bf16.mxu1 %v346_v3 }
   0xf   :  { %p330_p4 = pnand %p329_p3, %p323_p0 }
  0x11   :  { %305 = vmatpush3.bf16.msra.mxu1 %v304_v20 }
  0x12   :  { %306 = vmatprep.subr.bf16.mxu1 %v346_v3 }
  0x15   :  { %308 = vmatpush3.bf16.msra.mxu1 %v307_v23 }
  0x16   :  { %309 = vmatprep.subr.bf16.mxu1 %v346_v3 }
  0x19   :  { %311 = vmatpush3.bf16.msra.mxu1 %v310_v26 }
  0x1a   :  { %312 = vmatprep.subr.bf16.mxu1 %v346_v3 }
  0x1d   :  { %314 = vmatpush3.bf16.msra.mxu1 %v313_v29 }
  0x1e   :  { %315 = vmatprep.subr.bf16.mxu1 %v346_v3 }
  0x21   :  { %317 = vmatpush3.bf16.msra.mxu1 %v316_v32 }
  0xde   :  { %v103_v34 = vpop.f32.mrb[0].mxu0 }
  0xdf   :  { %v104_v35 = vadd.f32 %v217_v33, %v103_v34  ;;  %v252_v36 = vpop.f32.mrb[1].mxu0 }
  0xe1   :  { %v107_v37 = vmax.f32 %v104_v35, 0.0 }
  0xe3   :  { %286 = vmatmul.mubr.f32.vlgmr.msra.gmra.mrb[0].mxu1 %v107_v37 }
 0x1b6   :  { %v197_v39 = vpop.f32.mrb[0].mxu1 }
 0x1b7   :  { %v198_v40 = vadd.f32 %v219_v38, %v197_v39  ;;  %v287_v41 = vpop.f32.mrb[1].mxu1 }
 0x1b9   :  { %202 = vst.msk [vmem:[#allocation2] sm:$0xff] %vm201_vm2, %v198_v40 }
 0x1ba   :  { %333 = shalt.err (!%p330_p4)
}
 0x1bb   :  { %s334_s14 = scalar_lea.hbm %s466_s5, 128 }
 0x1bc   :  { %p335_p5 = scmp.ne.s32.totalorder %s466_s5, %s334_s14  ;;  %p338_p6 = scmp.lt.u32.totalorder %s334_s14, %s466_s5 }
 0x1be   :  { %p340_p7 = pnand %p338_p6, %p335_p5 }
 0x1c0   :  { %343 = shalt.err (!%p340_p7)
}
 0x1c1   :  { %212 = dma.vmem_to_hbm [thread:$0]  %s210_s12, 128, %s466_s5, [#allocation3]  }
 0x1c2   :  { %344 = dma.done.wait [#allocation3], 128  }
 0x1c3   :  { %345 = vsyncadd [#allocation3], 4294967168 }
 0x1c4   :  { %216 = vsyncpa [#allocation3], 1 }

</bundles_post_ra>
